<compile_context>
chip_gen: v6e
topology: v6e:2x2x1
jax: 0.10.0
libtpu: 0.0.40
codegen_flags: <defaults>
</compile_context>

<pallas_src>
import math

import jax
import jax.numpy as jnp
from jax import lax
from jax.experimental import pallas as pl
from jax.experimental.pallas import tpu as pltpu


def _round_up(n, m):
    return ((n + m - 1) // m) * m


def token_embedding_kernel(x_ref, halo_ref, w_ref, o_ref):
    # x_ref:    (tile, C)   rows t0 .. t0+tile-1 of the (circularly padded) sequence
    # halo_ref: (sub, C)    row 0 = x[(t0-1) % L], row 1 = x[(t0+tile) % L]
    # w_ref:    (3, C, Dp)  conv taps; tap k multiplies x[t-1+k]
    # o_ref:    (tile, Dp)
    x_blk = x_ref[...]
    h = halo_ref[...]
    tile = x_blk.shape[0]

    row = lax.broadcasted_iota(jnp.int32, x_blk.shape, 0)
    prev_fill = jnp.broadcast_to(h[0:1, :], x_blk.shape)
    next_fill = jnp.broadcast_to(h[1:2, :], x_blk.shape)

    # prev_rows[i] = x[t0+i-1]; next_rows[i] = x[t0+i+1]  (block-boundary rows via halo)
    prev_rows = jnp.where(row == 0, prev_fill, pltpu.roll(x_blk, 1, axis=0))
    next_rows = jnp.where(row == tile - 1, next_fill, pltpu.roll(x_blk, tile - 1, axis=0))

    acc = jnp.dot(prev_rows, w_ref[0], preferred_element_type=jnp.float32)
    acc = acc + jnp.dot(x_blk, w_ref[1], preferred_element_type=jnp.float32)
    acc = acc + jnp.dot(next_rows, w_ref[2], preferred_element_type=jnp.float32)
    o_ref[...] = acc.astype(o_ref.dtype)


def _vmem_sizes():
    """Chip-aware (v5e/v6e: 128 MiB, v7x: 64 MiB) budgets for pipelined blocks."""
    phys = 64 << 20  # conservative default = v7x physical VMEM
    try:
        info = pltpu.get_tpu_info()
        phys = int(getattr(info, "vmem_capacity_bytes", phys))
    except Exception:
        pass
    block_budget = min(max(phys // 5, 8 << 20), 24 << 20)   # blocks incl. double buffers
    vmem_limit = int(max(min(phys // 2, 64 << 20), 32 << 20))
    return block_budget, vmem_limit


def _choose_tiling(B, L, C, Dp, itemsize, sub, budget):
    """Row tile (multiple of `sub`) and per-batch block count."""
    L_sub = _round_up(L, sub)
    # Double-buffered VMEM blocks: weight (3*C*Dp) + halo (sub*C) are fixed;
    # x block (tile*C) and out block (tile*Dp) scale with the tile.
    fixed = 2 * itemsize * (sub * C + 3 * C * Dp)
    per_row = 2 * itemsize * (C + Dp)
    avail = max(budget - fixed, sub * per_row)
    max_tile = max(sub, min(avail // per_row, 2048))
    max_tile = (max_tile // sub) * sub
    nblocks = max(1, -(-L_sub // max_tile))
    # v7x has 2 TensorCores: keep >= 2 grid steps whenever the problem splits.
    if B * nblocks < 2 and L_sub >= 2 * sub:
        nblocks = 2
    tile = _round_up(-(-L // nblocks), sub)
    return tile, nblocks


def token_embedding(x, weight):
    """x: [B, L, c_in]; weight: [d_model, c_in, 3] (PyTorch Conv1d layout).

    Returns [B, L, d_model] == Conv1d(kernel=3, circular pad=1, no bias) along L.
    """
    B, L, C = x.shape
    D = weight.shape[0]
    dtype = x.dtype
    itemsize = jnp.dtype(dtype).itemsize
    sub = max(8, 32 // itemsize)          # sublane pack: 8 f32 / 16 bf16 / 32 int8
    Dp = _round_up(D, 128)                # lane-dense output (unmasked stores)

    budget, vmem_limit = _vmem_sizes()
    tile, nblocks = _choose_tiling(B, L, C, Dp, itemsize, sub, budget)
    L_pad = tile * nblocks
    G = B * nblocks

    # Circular pad along the sequence only when L does not tile evenly; padded
    # rows are wrapped copies so in-block "next" taps at t == L-1 stay correct,
    # and the extra output rows are sliced away below.
    if L_pad == L:
        x_pad = x
    else:
        x_pad = jnp.take(x, jnp.arange(L_pad) % L, axis=1)
    x_flat = x_pad.reshape(B * L_pad, C)

    # Per-block halo rows (2 meaningful rows per block, padded to `sub` rows).
    t0 = jnp.arange(nblocks) * tile
    halo_prev = jnp.take(x, (t0 - 1) % L, axis=1)      # (B, nblocks, C)
    halo_next = jnp.take(x, (t0 + tile) % L, axis=1)   # (B, nblocks, C)
    halo = jnp.concatenate(
        [halo_prev[:, :, None, :], halo_next[:, :, None, :],
         jnp.zeros((B, nblocks, sub - 2, C), dtype)], axis=2)
    halo_flat = halo.reshape(B * nblocks * sub, C)

    # PyTorch weight (D, C, 3) -> (3, C, Dp); tap k multiplies x[t-1+k].
    w3 = jnp.transpose(weight, (2, 1, 0)).astype(dtype)
    if Dp != D:
        w3 = jnp.pad(w3, ((0, 0), (0, 0), (0, Dp - D)))

    flops = 6 * B * L_pad * C * Dp
    bytes_accessed = itemsize * (x_flat.size + halo_flat.size + w3.size + B * L_pad * Dp)

    out = pl.pallas_call(
        token_embedding_kernel,
        out_shape=jax.ShapeDtypeStruct((B * L_pad, Dp), dtype),
        grid=(G,),
        in_specs=[
            pl.BlockSpec((tile, C), lambda g: (g, 0)),
            pl.BlockSpec((sub, C), lambda g: (g, 0)),
            pl.BlockSpec((3, C, Dp), lambda g: (0, 0, 0)),  # constant -> fetched once
        ],
        out_specs=pl.BlockSpec((tile, Dp), lambda g: (g, 0)),
        compiler_params=pltpu.CompilerParams(
            dimension_semantics=("parallel",),
            vmem_limit_bytes=vmem_limit),
        cost_estimate=pl.CostEstimate(
            flops=flops, transcendentals=0, bytes_accessed=bytes_accessed),
    )(x_flat, halo_flat, w3)

    out = out.reshape(B, L_pad, Dp)
    return out[:, :L, :D]


def token_embedding_ref(x, weight):
    """Pure-JAX reference of the circular conv (for verification)."""
    x_prev = jnp.roll(x, shift=1, axis=1)
    x_next = jnp.roll(x, shift=-1, axis=1)
    w = jnp.transpose(weight, (2, 1, 0))  # (3, C, D)
    return x_prev @ w[0] + x @ w[1] + x_next @ w[2]


if __name__ == "__main__":
    # Small shapes consistent with the module: x is [batch, seq_len, c_in]
    B, L, C_IN, D_MODEL = 2, 8, 4, 32

    key = jax.random.PRNGKey(0)
    kx, kw = jax.random.split(key)

    x = jax.random.normal(kx, (B, L, C_IN), dtype=jnp.float32)

    # Deterministic kaiming_normal_(mode='fan_in', nonlinearity='leaky_relu'), a=0
    fan_in = C_IN * 3
    std = math.sqrt(2.0) / math.sqrt(fan_in)
    weight = std * jax.random.normal(kw, (D_MODEL, C_IN, 3), dtype=jnp.float32)

    out = jax.block_until_ready(token_embedding(x, weight))
    ref = token_embedding_ref(x, weight)

    assert out.shape == (B, L, D_MODEL), out.shape
    assert jnp.allclose(out, ref, atol=1e-5, rtol=1e-5), "mismatch vs reference"

    print("KERNEL_OK")
</pallas_src>

<mosaic_0001>
module attributes {stable_mosaic.version = 11 : i64} {
  func.func @token_embedding_kernel(%arg0: i32, %arg1: memref<8x4xf32, #tpu.memory_space<vmem>>, %arg2: memref<8x4xf32, #tpu.memory_space<vmem>>, %arg3: memref<3x4x128xf32, #tpu.memory_space<vmem>>, %arg4: memref<8x128xf32, #tpu.memory_space<vmem>>) attributes {dimension_semantics = [#tpu.dimension_semantics<parallel>], iteration_bounds = array<i64: 2>, scalar_prefetch = 0 : i64, scratch_operands = 0 : i64, tpu.core_type = #tpu.core_type<tc>, window_params = [{transform_indices = @transform_0, window_bounds = array<i64: 8, 4>}, {transform_indices = @transform_1, window_bounds = array<i64: 8, 4>}, {pipeline_mode = #tpu.pipeline_mode<synchronous>, transform_indices = @transform_2, window_bounds = array<i64: 3, 4, 128>}, {transform_indices = @transform_3, window_bounds = array<i64: 8, 128>}]} {
    %c0 = arith.constant 0 : index
    %c0_0 = arith.constant 0 : index
    %0 = vector.load %arg1[%c0, %c0_0] : memref<8x4xf32, #tpu.memory_space<vmem>>, vector<8x4xf32>
    %c0_1 = arith.constant 0 : index
    %c0_2 = arith.constant 0 : index
    %1 = vector.load %arg2[%c0_1, %c0_2] : memref<8x4xf32, #tpu.memory_space<vmem>>, vector<8x4xf32>
    %2 = tpu.iota {dimensions = array<i32: 0>} : vector<8x4xi32>
    %3 = vector.extract_strided_slice %1 {offsets = [0, 0], sizes = [1, 4], strides = [1, 1]} : vector<8x4xf32> to vector<1x4xf32>
    %4 = vector.shape_cast %3 : vector<1x4xf32> to vector<1x4xf32>
    %5 = vector.broadcast %4 : vector<1x4xf32> to vector<8x4xf32>
    %6 = vector.extract_strided_slice %1 {offsets = [1, 0], sizes = [1, 4], strides = [1, 1]} : vector<8x4xf32> to vector<1x4xf32>
    %7 = vector.shape_cast %6 : vector<1x4xf32> to vector<1x4xf32>
    %8 = vector.broadcast %7 : vector<1x4xf32> to vector<8x4xf32>
    %c0_i32 = arith.constant 0 : i32
    %9 = vector.broadcast %c0_i32 : i32 to vector<8x4xi32>
    %10 = arith.cmpi eq, %2, %9 : vector<8x4xi32>
    %c1_i32 = arith.constant 1 : i32
    %11 = tpu.dynamic_rotate %0 by %c1_i32 dim 0 : vector<8x4xf32>, i32 -> vector<8x4xf32>
    %12 = arith.select %10, %5, %11 : vector<8x4xi1>, vector<8x4xf32>
    %c7_i32 = arith.constant 7 : i32
    %13 = vector.broadcast %c7_i32 : i32 to vector<8x4xi32>
    %14 = arith.cmpi eq, %2, %13 : vector<8x4xi32>
    %c7_i32_3 = arith.constant 7 : i32
    %15 = tpu.dynamic_rotate %0 by %c7_i32_3 dim 0 : vector<8x4xf32>, i32 -> vector<8x4xf32>
    %16 = arith.select %14, %8, %15 : vector<8x4xi1>, vector<8x4xf32>
    %c0_4 = arith.constant 0 : index
    %c0_5 = arith.constant 0 : index
    %c0_6 = arith.constant 0 : index
    %17 = vector.load %arg3[%c0_4, %c0_5, %c0_6] : memref<3x4x128xf32, #tpu.memory_space<vmem>>, vector<1x4x128xf32>
    %18 = vector.shape_cast %17 : vector<1x4x128xf32> to vector<4x128xf32>
    %cst = arith.constant dense<0.000000e+00> : vector<8x128xf32>
    %19 = tpu.matmul %12, %18, %cst {dimension_numbers = #tpu.dot_dimension_numbers<[1], [0], [0], [1], [0, 0, 1, 1], [], []>} : vector<8x4xf32>, vector<4x128xf32>, vector<8x128xf32> -> vector<8x128xf32>
    %c1 = arith.constant 1 : index
    %c0_7 = arith.constant 0 : index
    %c0_8 = arith.constant 0 : index
    %20 = vector.load %arg3[%c1, %c0_7, %c0_8] : memref<3x4x128xf32, #tpu.memory_space<vmem>>, vector<1x4x128xf32>
    %21 = vector.shape_cast %20 : vector<1x4x128xf32> to vector<4x128xf32>
    %cst_9 = arith.constant dense<0.000000e+00> : vector<8x128xf32>
    %22 = tpu.matmul %0, %21, %cst_9 {dimension_numbers = #tpu.dot_dimension_numbers<[1], [0], [0], [1], [0, 0, 1, 1], [], []>} : vector<8x4xf32>, vector<4x128xf32>, vector<8x128xf32> -> vector<8x128xf32>
    %23 = arith.addf %19, %22 : vector<8x128xf32>
    %c2 = arith.constant 2 : index
    %c0_10 = arith.constant 0 : index
    %c0_11 = arith.constant 0 : index
    %24 = vector.load %arg3[%c2, %c0_10, %c0_11] : memref<3x4x128xf32, #tpu.memory_space<vmem>>, vector<1x4x128xf32>
    %25 = vector.shape_cast %24 : vector<1x4x128xf32> to vector<4x128xf32>
    %cst_12 = arith.constant dense<0.000000e+00> : vector<8x128xf32>
    %26 = tpu.matmul %16, %25, %cst_12 {dimension_numbers = #tpu.dot_dimension_numbers<[1], [0], [0], [1], [0, 0, 1, 1], [], []>} : vector<8x4xf32>, vector<4x128xf32>, vector<8x128xf32> -> vector<8x128xf32>
    %27 = arith.addf %23, %26 : vector<8x128xf32>
    %c0_13 = arith.constant 0 : index
    %c0_14 = arith.constant 0 : index
    %28 = vector.load %arg4[%c0_13, %c0_14] : memref<8x128xf32, #tpu.memory_space<vmem>>, vector<8x128xf32>
    tpu.vector_store %arg4[%c0_13, %c0_14], %27 {strides = array<i32>} : memref<8x128xf32, #tpu.memory_space<vmem>>, vector<8x128xf32>,
    return
  }
  func.func @transform_0(%arg0: i32) -> (i32, i32) {
    %c0_i32 = arith.constant 0 : i32
    %c0_i32_0 = arith.constant 0 : i32
    return %arg0, %c0_i32 : i32, i32
  }
  func.func @transform_1(%arg0: i32) -> (i32, i32) {
    %c0_i32 = arith.constant 0 : i32
    %c0_i32_0 = arith.constant 0 : i32
    return %arg0, %c0_i32 : i32, i32
  }
  func.func @transform_2(%arg0: i32) -> (i32, i32, i32) {
    %c0_i32 = arith.constant 0 : i32
    %c0_i32_0 = arith.constant 0 : i32
    %c0_i32_1 = arith.constant 0 : i32
    %c0_i32_2 = arith.constant 0 : i32
    return %c0_i32, %c0_i32_0, %c0_i32_1 : i32, i32, i32
  }
  func.func @transform_3(%arg0: i32) -> (i32, i32) {
    %c0_i32 = arith.constant 0 : i32
    %c0_i32_0 = arith.constant 0 : i32
    return %arg0, %c0_i32 : i32, i32
  }
}

</mosaic_0001>

<bundles_post_ra>
// kernel: tpu_custom_call.1
= control target key start
LH: loop header
LB: loop body
LE: loop exit
PB: predicated region body
PF: predicated region fallthrough
CT: control target
= control target key end

     0   :  { %8 = vsyncpa [#allocation3], 0  ;;  %s797_s0 = inlined_call_operand.vmem [shape: f32[16,4], index: 0, kind: input, shape index: {}]   ;;  %s798_s1 = inlined_call_operand.vmem [shape: f32[16,4], index: 1, kind: input, shape index: {}]   ;;  %s799_s2 = inlined_call_operand.vmem [shape: f32[3,4,128], index: 2, kind: input, shape index: {}]   ;;  %s800_s3 = inlined_call_operand.hbm [shape: f32[16,128], index: 3, kind: output, shape index: {}]  }
   0x1   :  { %10 = vsyncpa [#allocation3 + $0x1], 0  ;;  %s689_s12 = smov 0   ;;  %s691_s13 = smov 0  }
   0x2   :  { %s693_s14 = smov 0   ;;  %s695_s15 = smov 0  }
   0x3 LB: > { %s710_s16 = sadd.s32 4294967295, %s664_s15   ;;  %s523_s17 = sadd.s32 4294967294, %s664_s15   ;;  %s664_s15 = sphi %s695_s15, %s806_s15   ;;  %s660_s14 = sphi %s693_s14, %s805_s14   ;;  %s656_s13 = sphi %s691_s13, %s804_s13   ;;  %s652_s12 = sphi %s689_s12, %s803_s12  }
   0x4   : > { %s714_s18 = sadd.s32 1, %s664_s15   ;;  %s96_s19 = sadd.s32 1, %s660_s14 }
   0x5   : > { %s93_s20 = ssub.s32 %s664_s15, %s714_s18  ;;  %p106_p0 = scmp.ne.s32.totalorder %s660_s14, %s656_s13 }
   0x6   : > { %p94_p1 = scmp.eq.s32.totalorder %s93_s20, 0  ;;  %p107_p2 = scmp.eq.s32.totalorder %s710_s16, 1 }
   0x7   : > { %p112_p3 = scmp.ne.s32.totalorder %s656_s13, %s652_s12  ;;  %p113_p4 = scmp.eq.s32.totalorder %s523_s17, 1 }
   0x8   : > { %s725_s21 = scalar_select %p94_p1, %s660_s14, %s96_s19  }
   0x9   : > { %p727_p5 = por %p107_p2, %p106_p0  ;;  %p731_p6 = por %p113_p4, %p112_p3 }
   0xa   : > { %p526_p7 = scmp.ge.s32.totalorder %s664_s15, 1  ;;  %p148_p8 = scmp.lt.s32.totalorder %s664_s15, 3 }
   0xc   : > { %p149_p9 = pnand %p526_p7, %p148_p8 }
   0xd   : > { %p175_p10 = scmp.lt.s32.totalorder (!%p149_p9), %s710_s16, 1  ;;  %s172_s11 = sand.u32 (!%p149_p9), 1, %s656_s13  }
   0xe   : > { %152 = sbr.rel (%p149_p9) target bundleno = 238 (0xee), region = 32  ;;  %s527_s17 = sshll.u32 (!%p149_p9), %s172_s11, 3 }
   0xf   : > { %s539_s19 = sshll.u32 (!%p149_p9), %s710_s16, 7  ;;  %s174_s20 = scalar_lea.vmem (!%p149_p9), [#allocation2], %s527_s17 }
  0x10   : > { %s452_s24 = sshll.u32 (!%p149_p9), %s174_s20, 4  ;;  %s450_s27 = scalar_lea.hbm (!%p149_p9), %s800_s3, %s539_s19  ;;  %s453_s24 = int_to_ptr.vmem [resolvable:$true] %s452_s24 }
  0x13   : > { %v530_v0 = vld [vmem:[%s799_s2 + $0x4] sm:$0xf]  ;;  %vm208_vm0 = vcmask 1043456   ;;  %v185_v1 = vlaneseq  ;;  %v666_v2 = vmov 0.0   ;;  %vm667_vm1 = vmmov 0   ;;  %s176_s28 = scalar_select %p175_p10, %s710_s16, 1 }
  0x14   : > { %548 = vmatprep.subr.mxu0 %v666_v2  ;;  %550 = vmatprep.mubr.msk.f32.mxu0 %vm667_vm1, %v666_v2  ;;  %v201_v3 = vld [vmem:[%s799_s2] sm:$0xf]  ;;  %vm204_vm2 = vcmask 31744   ;;  %v535_v7 = vld [vmem:[%s799_s2 + $0x8] sm:$0xf]  ;;  %s668_s16 = smov [#allocation2]  }
  0x15   : > { %549 = vmatpush3.msk.msra.mxu0 %vm208_vm0, %v530_v0  ;;  %v186_v4 = vshrl.u32 %v185_v1, 7  ;;  %553 = vmatprep.subr.mxu1 %v666_v2  ;;  %s528_s29 = sshll.u32 %s176_s28, 3  ;;  %s439_s28 = scalar_lea.sflag [#allocation3], %s172_s11 }
  0x16   : > { %558 = vmatprep.subr.mxu0 %v666_v2  ;;  %554 = vmatpush3.msk.msra.mxu1 %vm208_vm0, %v201_v3  ;;  %s178_s5 = scalar_lea.vmem %s797_s0, %s528_s29  ;;  %s182_s8 = scalar_lea.vmem %s798_s1, %s528_s29 }
  0x17   : > { %v189_v5 = vsub.s32 0, %v186_v4  ;;  %v193_v6 = vsub.s32 1, %v186_v4  ;;  %555 = vmatprep.mubr.msk.f32.mxu1 %vm667_vm1, %v666_v2  ;;  %v183_v8 = vld [vmem:[%s178_s5] sm:$0xff]  ;;  %vm195_vm3 = vcmp.eq.s32.totalorder %v186_v4, 0  ;;  %vm198_vm4 = vcmp.eq.s32.totalorder %v186_v4, 7  ;;  %s604_s29 = scalar_lea.vmem %s453_s24, 128 }
  0x18   : > { %v184_v9 = vld [vmem:[%s182_s8] sm:$0xff]  ;;  %v196_v12 = vrot.slane %v183_v8, 7  ;;  %v199_v13 = vrot.slane %v183_v8, 1  ;;  %551 = vmatmul.mubr.msk.f32.vlgmr.msra.gmra.mxu0 %vm204_vm2, %v183_v8  ;;  %p605_p11 = scmp.ne.s32.totalorder %s453_s24, %s604_s29  ;;  %s608_s30 = sshll.u32 %s668_s16, 4  ;;  %s609_s30 = int_to_ptr.vmem [resolvable:$false] %s608_s30 }
  0x19   : > { %v190_v10 = vrot.slane %v184_v9, %v189_v5  ;;  %v194_v11 = vrot.slane %v184_v9, %v193_v6  ;;  %559 = vmatpush3.msk.msra.mxu0 %vm208_vm0, %v535_v7  ;;  %560 = vmatprep.mubr.msk.f32.mxu0 %vm667_vm1, %v666_v2  ;;  %s610_s4 = scalar_lea.vmem %s609_s30, 256  ;;  %p611_p0 = scmp.lt.s32.totalorder %s453_s24, %s609_s30 }
  0x1a   : > { %p606_p12 = pnand %p605_p11, %p727_p5  ;;  %p612_p1 = scmp.lt.s32.totalorder %s610_s4, %s604_s29 }
  0x1b   : > { %v197_v14 = vsel %vm195_vm3, %v190_v10, %v196_v12  ;;  %v200_v15 = vsel %vm198_vm4, %v194_v11, %v199_v13 }
  0x1c   : > { %556 = vmatmul.mubr.msk.f32.vlgmr.msra.gmra.mxu1 %vm204_vm2, %v197_v14  ;;  %561 = vmatmul.mubr.msk.f32.vlgmr.msra.gmra.mxu0 %vm204_vm2, %v200_v15  ;;  %p607_p13 = pneg %p606_p12  ;;  %p613_p2 = por %p612_p1, %p611_p0 }
  0x1e   : > { %p614_p3 = pnand %p613_p2, %p607_p13 }
  0xd8   : > { %v278_v16 = vpop.f32.mrf.mxu0 }
  0xda   : > { %v552_v17 = vpop.f32.mrf.mxu0 }
  0xdc   : > { %v354_v18 = vpop.f32.mrf.mxu1  ;;  %v432_v20 = vpop.f32.mrf.mxu0 }
  0xdd   : > { %v355_v19 = vadd.f32 %v354_v18, %v278_v16 }
  0xde   : > { %v557_v21 = vpop.f32.mrf.mxu1  ;;  %v562_v23 = vpop.f32.mrf.mxu0 }
  0xdf   : > { %v436_v22 = vadd.f32 %v432_v20, %v355_v19 }
  0xe1   : > { %437 = vst [vmem:[%s174_s20] sm:$0xff] %v436_v22 }
  0xe2   : > { %617 = shalt.err (!%p614_p3)
}
  0xe3   : > { %s618_s5 = scalar_lea.hbm %s450_s27, 128  ;;  %s622_s8 = scalar_lea.hbm %s800_s3, 256 }
  0xe4   : > { %p619_p4 = scmp.ne.s32.totalorder %s450_s27, %s618_s5  ;;  %p623_p9 = scmp.lt.s32.totalorder %s450_s27, %s800_s3 }
  0xe5   : > { %p624_p10 = scmp.lt.s32.totalorder %s622_s8, %s618_s5 }
  0xe6   : > { %p620_p7 = pnand %p619_p4, %p727_p5 }
  0xe7   : > { %p625_p11 = por %p624_p10, %p623_p9 }
  0xe8   : > { %p621_p8 = pneg %p620_p7 }
  0xea   : > { %p626_p12 = pnand %p625_p11, %p621_p8 }
  0xec   : > { %629 = shalt.err (!%p626_p12)
}
  0xed   : > { %563 = dma.vmem_to_hbm [thread:$0]  (%p727_p5), %s453_s24, 128, %s450_s27, %s439_s28  }
  0xee PF: > { %p569_p13 = scmp.ge.s32.totalorder %s664_s15, 2  ;;  %s464_s11 = sand.u32 1, %s652_s12  }
  0xef   : > { %s465_s17 = scalar_lea.sflag [#allocation3], %s464_s11 }
  0xf0   : > { %p566_p0 = pnand %p569_p13, %p731_p6 }
  0xf2   : > { %p567_p1 = pneg %p566_p0 }
  0xf4   : > { %647 = dma.done.wait (%p567_p1), %s465_s17, 128  }
  0xf5   : > { %649 = vsyncadd (%p567_p1), %s465_s17, 4294967168  ;;  %p13_p2 = scmp.ge.s32.totalorder %s714_s18, 4   ;;  %s803_s12 = smov %s656_s13 }
  0xf6   : > { %s804_s13 = smov %s660_s14  ;;  %s805_s14 = smov %s725_s21 }
  0xf7   : > { %s806_s15 = smov %s714_s18  ;;  %15 = sbr.rel (!%p13_p2) target bundleno = 3 (0x3), region = 72 }
  0xfc   :  { %470 = vsyncpa [#allocation3], 1 }
  0xfd   :  { %472 = vsyncpa [#allocation3 + $0x1], 1 }

</bundles_post_ra>
